<compile_context>
chip_gen: v7x
topology: tpu7x:2x2x1
jax: 0.10.0
libtpu: 0.0.40
codegen_flags: <defaults>
</compile_context>

<pallas_src>
import functools

import jax
import jax.numpy as jnp
from jax import lax
from jax.experimental import pallas as pl
from jax.experimental.pallas import tpu as pltpu


def _round_up(a, b):
    return (a + b - 1) // b * b


def _vmem_capacity_bytes():
    """Physical VMEM per core (chip-aware cap for tiling / vmem_limit_bytes)."""
    try:
        cap = getattr(pltpu.get_tpu_info(), "vmem_capacity_bytes", None)
        if cap:
            return int(cap)
    except Exception:
        pass
    try:
        kind = jax.devices()[0].device_kind.lower()
        if "v7" in kind:
            return 64 * 1024 * 1024
    except Exception:
        pass
    return 128 * 1024 * 1024  # v5e / v6e


def prepare_nemotron_h_mlp_weights(w_up, w_down, dtype=None):
    """One-time (weight-load-time) layout prep.

    w_up   : (I, H) PyTorch nn.Linear layout -- kept as-is: its per-k row slab (ti, H)
             is already a contiguous DMA, and x @ slab^T is the MXU-native
             transposed-RHS contraction (same form as q @ k^T in flash attention).
    w_down : (H, I) PyTorch layout -> transposed to (I, H) so the per-k slab becomes a
             contiguous (ti, H) row DMA and the down-proj contraction is the canonical
             (tm, ti) @ (ti, H) form.
    dtype  : optionally cast weights here once (e.g. jnp.bfloat16) instead of per call.
    """
    w_up = jnp.asarray(w_up)
    w_down_t = jnp.asarray(w_down).T
    if dtype is not None:
        w_up = w_up.astype(dtype)
        w_down_t = w_down_t.astype(dtype)
    return w_up, w_down_t


def _nemotron_mlp_kernel(*refs, has_bias: bool, needs_acc: bool):
    # Ref order: x, w_up, w_down_t, [b_up, b_down], o, [acc]
    if has_bias:
        x_ref, w_up_ref, w_down_ref, b_up_ref, b_down_ref = refs[:5]
        rest = refs[5:]
    else:
        x_ref, w_up_ref, w_down_ref = refs[:3]
        b_up_ref = b_down_ref = None
        rest = refs[3:]
    o_ref = rest[0]
    acc_ref = rest[1] if needs_acc else o_ref  # f32 outputs accumulate in-place

    k = pl.program_id(1)
    ti = w_up_ref.shape[0]

    x = x_ref[...]
    if x.dtype != w_up_ref.dtype:  # safety; wrapper normally matches dtypes already
        x = x.astype(w_up_ref.dtype)

    # Up projection: x (tm, H) @ w_up_slab (ti, H)^T -> (tm, ti), f32 accumulation on MXU.
    # (Contraction on the last dim of both operands: MXU-native, contiguous slab DMA.)
    h = lax.dot_general(
        x, w_up_ref[...],
        dimension_numbers=(((1,), (1,)), ((), ())),
        preferred_element_type=jnp.float32)

    if has_bias:
        start = pl.multiple_of(k * ti, 128)
        h = h + b_up_ref[:, pl.ds(start, ti)].astype(jnp.float32)

    # relu2 activation: relu(h) ** 2  (elementwise, independent per I tile)
    h = jnp.maximum(h, 0.0)
    h = h * h

    # Down projection partial: h (tm, ti) @ w_down_t_slab (ti, H) -> (tm, H), canonical form.
    partial = lax.dot_general(
        h.astype(w_down_ref.dtype), w_down_ref[...],
        dimension_numbers=(((1,), (0,)), ((), ())),
        preferred_element_type=jnp.float32)

    # k == 0: write directly (no zero-fill + read-back of zeros); k > 0: accumulate.
    @pl.when(k == 0)
    def _first():
        acc_ref[...] = partial

    @pl.when(k > 0)
    def _accumulate():
        acc_ref[...] += partial

    if needs_acc or has_bias:
        @pl.when(k == pl.num_programs(1) - 1)
        def _finalize():
            y = acc_ref[...]
            if has_bias:
                y = y + b_down_ref[...].astype(jnp.float32)
            o_ref[...] = y.astype(o_ref.dtype)


def nemotron_h_mlp(x, w_up, w_down_t, b_up=None, b_down=None, *,
                   tm=1024, ti=512, matmul_in_bf16=False):
    """Fused NemotronHMLP forward: down_proj(relu2(up_proj(x))).

    Args:
      x:         (batch, seq, hidden) activations (f32 or bf16).
      w_up:      (intermediate, hidden)  -- PyTorch nn.Linear layout (kept).
      w_down_t:  (intermediate, hidden)  -- down_proj.weight PRE-TRANSPOSED once at load
                 time; use prepare_nemotron_h_mlp_weights().
      b_up/b_down: optional biases (config.mlp_bias; default None/False).
      tm:        token tile (auto-shrunk for small M / chip VMEM budget).
      ti:        intermediate tile (multiple of 128; I is zero-padded if needed).
      matmul_in_bf16: cast f32 matmul operands to bf16 (f32 accumulation kept).
    """
    B, S, H = x.shape
    I = w_up.shape[0]
    assert w_up.shape == (I, H), "up_proj weight must be (intermediate, hidden)"
    assert w_down_t.shape == (I, H), (
        "down_proj weight must be pre-transposed to (intermediate, hidden); "
        "use prepare_nemotron_h_mlp_weights()")

    out_dtype = x.dtype
    M = B * S
    x2d = x.reshape(M, H)

    # Optional bf16 matmul path. TODO(synk): in production cast the weights once at
    # load time (prepare_nemotron_h_mlp_weights(..., dtype=jnp.bfloat16)), not per call.
    if matmul_in_bf16:
        w_up = w_up.astype(jnp.bfloat16)
        w_down_t = w_down_t.astype(jnp.bfloat16)
    mm_dtype = w_up.dtype
    x_stream = x2d if x2d.dtype == mm_dtype else x2d.astype(mm_dtype)

    has_bias = (b_up is not None) or (b_down is not None)
    needs_acc = (jnp.dtype(out_dtype) != jnp.dtype(jnp.float32))

    it_in = jnp.dtype(x_stream.dtype).itemsize
    it_w = jnp.dtype(w_up.dtype).itemsize
    it_out = jnp.dtype(out_dtype).itemsize

    # --- tile sizes -------------------------------------------------------------
    sub = 8 if it_in >= 4 else 16                    # sublane packing of the x tile
    tm = max(sub, min(int(tm), _round_up(M, sub)))
    tm = _round_up(tm, sub)
    ti = max(128, min(int(ti), _round_up(I, 128)))
    ti = _round_up(ti, 128)

    vmem_cap = _vmem_capacity_bytes()
    budget = max(int(vmem_cap * 0.85), 24 * 1024 * 1024)

    def est(tm_, ti_):
        v = 2 * tm_ * H * it_in            # x tiles (double-buffered)
        v += 2 * ti_ * H * it_w            # up_proj weight slabs
        v += 2 * ti_ * H * it_w            # down_proj^T weight slabs
        v += 2 * tm_ * H * it_out          # output tiles
        if needs_acc:
            v += tm_ * H * 4               # f32 accumulator scratch
        if has_bias:
            v += 2 * (_round_up(I, ti_) + H) * it_w
        return v

    # Shrink tm (then ti) until the working set fits the chip VMEM budget
    # (~54 MiB on v7x, ~108 MiB on v5e/v6e).
    while est(tm, ti) > budget and (tm > sub or ti > 128):
        if tm > sub:
            tm = max(sub, _round_up(tm // 2, sub))
        else:
            ti = max(128, _round_up(ti // 2, 128))

    M_pad = _round_up(M, tm)
    I_pad = _round_up(I, ti)   # pad I rather than making the full weights resident

    if M_pad != M:
        x_stream = jnp.pad(x_stream, ((0, M_pad - M), (0, 0)))
    if I_pad != I:
        w_up = jnp.pad(w_up, ((0, I_pad - I), (0, 0)))
        w_down_t = jnp.pad(w_down_t, ((0, I_pad - I), (0, 0)))

    operands = [x_stream, w_up, w_down_t]
    in_specs = [
        pl.BlockSpec((tm, H), lambda i, k: (i, 0)),    # token tile (resident across k)
        pl.BlockSpec((ti, H), lambda i, k: (k, 0)),    # up_proj (I,H) row slab: contiguous DMA
        pl.BlockSpec((ti, H), lambda i, k: (k, 0)),    # down_proj^T (I,H) row slab: contiguous DMA
    ]
    if has_bias:
        b_up_arr = jnp.zeros((I,), w_up.dtype) if b_up is None else jnp.asarray(b_up)
        b_down_arr = jnp.zeros((H,), w_up.dtype) if b_down is None else jnp.asarray(b_down)
        if I_pad != I:
            b_up_arr = jnp.pad(b_up_arr, (0, I_pad - I))
        operands += [b_up_arr.reshape(1, I_pad), b_down_arr.reshape(1, H)]
        in_specs += [
            pl.BlockSpec((1, I_pad), lambda i, k: (0, 0)),   # full up-bias resident; sliced in-kernel
            pl.BlockSpec((1, H), lambda i, k: (0, 0)),       # down-bias resident
        ]

    grid = (M_pad // tm, I_pad // ti)
    scratch = [pltpu.VMEM((tm, H), jnp.float32)] if needs_acc else []

    vmem_est = est(tm, ti)
    vmem_limit = int(min(budget, max(vmem_est * 5 // 4, 32 * 1024 * 1024)))

    # CostEstimate: weights are re-streamed once per token tile (grid[0] times).
    weight_bytes = 2 * I_pad * H * it_w + ((I_pad + H) * it_w if has_bias else 0)
    cost = pl.CostEstimate(
        flops=4 * M_pad * H * I_pad,
        transcendentals=0,
        bytes_accessed=int(M_pad * H * (it_in + it_out) + grid[0] * weight_bytes),
    )

    kernel = functools.partial(_nemotron_mlp_kernel,
                               has_bias=has_bias, needs_acc=needs_acc)

    out2d = pl.pallas_call(
        kernel,
        out_shape=jax.ShapeDtypeStruct((M_pad, H), out_dtype),
        grid_spec=pltpu.PrefetchScalarGridSpec(
            num_scalar_prefetch=0,
            grid=grid,
            in_specs=in_specs,
            out_specs=pl.BlockSpec((tm, H), lambda i, k: (i, 0)),
            scratch_shapes=scratch,
        ),
        compiler_params=pltpu.CompilerParams(
            dimension_semantics=("parallel", "arbitrary"),
            vmem_limit_bytes=vmem_limit,
        ),
        cost_estimate=cost,
    )(*operands)

    return out2d[:M].reshape(B, S, H)


def _reference(x, w_up, w_down, b_up=None, b_down=None):
    h = jnp.einsum("bsh,ih->bsi", x, w_up)
    if b_up is not None:
        h = h + b_up
    h = jnp.maximum(h, 0.0) ** 2
    y = jnp.einsum("bsi,hi->bsh", h, w_down)
    if b_down is not None:
        y = y + b_down
    return y


if __name__ == "__main__":
    key = jax.random.PRNGKey(0)
    kx, ku, kd, kbu, kbd = jax.random.split(key, 5)

    # Small shapes consistent with the module: batch=2, seq=8, hidden=128, intermediate=256.
    B, S, H, I = 2, 8, 128, 256
    x = jax.random.normal(kx, (B, S, H), dtype=jnp.float32)
    # PyTorch nn.Linear layout: (out_features, in_features)
    w_up = jax.random.normal(ku, (I, H), dtype=jnp.float32) * (H ** -0.5)
    w_down = jax.random.normal(kd, (H, I), dtype=jnp.float32) * (I ** -0.5)

    # One-time weight prep (down_proj transposed to (I, H) kernel layout).
    w_up_k, w_down_t_k = prepare_nemotron_h_mlp_weights(w_up, w_down)

    # 1) Default Nemotron-H config: mlp_bias=False, relu2, f32.
    out = jax.block_until_ready(nemotron_h_mlp(x, w_up_k, w_down_t_k))
    ref = _reference(x, w_up, w_down)
    assert out.shape == (B, S, H) and out.dtype == x.dtype
    assert jnp.allclose(out, ref, atol=2e-3, rtol=2e-3), "mismatch (no bias, f32)"

    # 2) mlp_bias=True path.
    b_up = jax.random.normal(kbu, (I,), dtype=jnp.float32) * 0.1
    b_down = jax.random.normal(kbd, (H,), dtype=jnp.float32) * 0.1
    out_b = jax.block_until_ready(nemotron_h_mlp(x, w_up_k, w_down_t_k, b_up, b_down))
    ref_b = _reference(x, w_up, w_down, b_up, b_down)
    assert jnp.allclose(out_b, ref_b, atol=2e-3, rtol=2e-3), "mismatch (bias, f32)"

    # 3) bf16 activations/weights with a non-128-divisible intermediate size
    #    (exercises the I zero-padding path and the f32 accumulator scratch path).
    I2 = 320
    w_up2 = jax.random.normal(ku, (I2, H), dtype=jnp.float32) * (H ** -0.5)
    w_down2 = jax.random.normal(kd, (H, I2), dtype=jnp.float32) * (I2 ** -0.5)
    w_up2_k, w_down2_t_k = prepare_nemotron_h_mlp_weights(w_up2, w_down2, dtype=jnp.bfloat16)
    x_bf = x.astype(jnp.bfloat16)
    out_bf = jax.block_until_ready(nemotron_h_mlp(x_bf, w_up2_k, w_down2_t_k))
    ref_bf = _reference(x_bf.astype(jnp.float32),
                        w_up2_k.astype(jnp.float32),
                        w_down2_t_k.T.astype(jnp.float32))
    assert out_bf.dtype == jnp.bfloat16
    assert jnp.allclose(out_bf.astype(jnp.float32), ref_bf, atol=1.5e-1, rtol=1e-1), \
        "mismatch (bf16, padded I)"

    # 4) f32 model with in-kernel bf16 matmuls (halved weight HBM traffic, bf16 MXU rate).
    out_fast = jax.block_until_ready(
        nemotron_h_mlp(x, w_up_k, w_down_t_k, matmul_in_bf16=True))
    assert out_fast.dtype == jnp.float32
    assert jnp.allclose(out_fast, ref, atol=1.5e-1, rtol=1e-1), "mismatch (bf16 matmul path)"

    print("KERNEL_OK")
</pallas_src>

<mosaic_0001>
module attributes {stable_mosaic.version = 11 : i64} {
  func.func @_nemotron_mlp_kernel(%arg0: i32, %arg1: i32, %arg2: memref<16x128xf32, #tpu.memory_space<vmem>>, %arg3: memref<256x128xf32, #tpu.memory_space<vmem>>, %arg4: memref<256x128xf32, #tpu.memory_space<vmem>>, %arg5: memref<16x128xf32, #tpu.memory_space<vmem>>) attributes {dimension_semantics = [#tpu.dimension_semantics<parallel>, #tpu.dimension_semantics<arbitrary>], iteration_bounds = array<i64: 1, 1>, scalar_prefetch = 0 : i64, scratch_operands = 0 : i64, tpu.core_type = #tpu.core_type<tc>, window_params = [{transform_indices = @transform_0, window_bounds = array<i64: 16, 128>}, {transform_indices = @transform_1, window_bounds = array<i64: 256, 128>}, {transform_indices = @transform_2, window_bounds = array<i64: 256, 128>}, {transform_indices = @transform_3, window_bounds = array<i64: 16, 128>}]} {
    %c0 = arith.constant 0 : index
    %c0_0 = arith.constant 0 : index
    %0 = vector.load %arg2[%c0, %c0_0] : memref<16x128xf32, #tpu.memory_space<vmem>>, vector<16x128xf32>
    %c0_1 = arith.constant 0 : index
    %c0_2 = arith.constant 0 : index
    %1 = vector.load %arg3[%c0_1, %c0_2] : memref<256x128xf32, #tpu.memory_space<vmem>>, vector<256x128xf32>
    %cst = arith.constant dense<0.000000e+00> : vector<16x256xf32>
    %2 = tpu.matmul %0, %1, %cst {dimension_numbers = #tpu.dot_dimension_numbers<[1], [1], [0], [0], [0, 0, 1, 0], [], []>} : vector<16x128xf32>, vector<256x128xf32>, vector<16x256xf32> -> vector<16x256xf32>
    %cst_3 = arith.constant 0.000000e+00 : f32
    %3 = vector.broadcast %cst_3 : f32 to vector<16x256xf32>
    %4 = arith.maximumf %2, %3 : vector<16x256xf32>
    %5 = arith.mulf %4, %4 : vector<16x256xf32>
    %c0_4 = arith.constant 0 : index
    %c0_5 = arith.constant 0 : index
    %6 = vector.load %arg4[%c0_4, %c0_5] : memref<256x128xf32, #tpu.memory_space<vmem>>, vector<256x128xf32>
    %cst_6 = arith.constant dense<0.000000e+00> : vector<16x128xf32>
    %7 = tpu.matmul %5, %6, %cst_6 {dimension_numbers = #tpu.dot_dimension_numbers<[1], [0], [0], [1], [0, 0, 1, 1], [], []>} : vector<16x256xf32>, vector<256x128xf32>, vector<16x128xf32> -> vector<16x128xf32>
    %c0_i32 = arith.constant 0 : i32
    %8 = arith.cmpi eq, %arg1, %c0_i32 : i32
    %9 = arith.extui %8 : i1 to i32
    %c0_i32_7 = arith.constant 0 : i32
    %10 = arith.cmpi ne, %9, %c0_i32_7 : i32
    scf.if %10 {
      %c0_10 = arith.constant 0 : index
      %c0_11 = arith.constant 0 : index
      %14 = vector.load %arg5[%c0_10, %c0_11] : memref<16x128xf32, #tpu.memory_space<vmem>>, vector<16x128xf32>
      tpu.vector_store %arg5[%c0_10, %c0_11], %7 {strides = array<i32>} : memref<16x128xf32, #tpu.memory_space<vmem>>, vector<16x128xf32>,
    } else {
    }
    %c0_i32_8 = arith.constant 0 : i32
    %11 = arith.cmpi sgt, %arg1, %c0_i32_8 : i32
    %12 = arith.extui %11 : i1 to i32
    %c0_i32_9 = arith.constant 0 : i32
    %13 = arith.cmpi ne, %12, %c0_i32_9 : i32
    scf.if %13 {
      %c0_10 = arith.constant 0 : index
      %c0_11 = arith.constant 0 : index
      %14 = vector.load %arg5[%c0_10, %c0_11] : memref<16x128xf32, #tpu.memory_space<vmem>>, vector<16x128xf32>
      %15 = arith.addf %14, %7 : vector<16x128xf32>
      %c0_12 = arith.constant 0 : index
      %c0_13 = arith.constant 0 : index
      %16 = vector.load %arg5[%c0_12, %c0_13] : memref<16x128xf32, #tpu.memory_space<vmem>>, vector<16x128xf32>
      tpu.vector_store %arg5[%c0_12, %c0_13], %15 {strides = array<i32>} : memref<16x128xf32, #tpu.memory_space<vmem>>, vector<16x128xf32>,
    } else {
    }
    return
  }
  func.func @transform_0(%arg0: i32, %arg1: i32) -> (i32, i32) {
    %c0_i32 = arith.constant 0 : i32
    %c0_i32_0 = arith.constant 0 : i32
    return %arg0, %c0_i32 : i32, i32
  }
  func.func @transform_1(%arg0: i32, %arg1: i32) -> (i32, i32) {
    %c0_i32 = arith.constant 0 : i32
    %c0_i32_0 = arith.constant 0 : i32
    return %arg1, %c0_i32 : i32, i32
  }
  func.func @transform_2(%arg0: i32, %arg1: i32) -> (i32, i32) {
    %c0_i32 = arith.constant 0 : i32
    %c0_i32_0 = arith.constant 0 : i32
    return %arg1, %c0_i32 : i32, i32
  }
  func.func @transform_3(%arg0: i32, %arg1: i32) -> (i32, i32) {
    %c0_i32 = arith.constant 0 : i32
    %c0_i32_0 = arith.constant 0 : i32
    return %arg0, %c0_i32 : i32, i32
  }
}

</mosaic_0001>

<bundles_post_ra>
// kernel: tpu_custom_call.1
= control target key start
LH: loop header
LB: loop body
LE: loop exit
PB: predicated region body
PF: predicated region fallthrough
CT: control target
= control target key end

     0   :  { %8 = vsyncpa [#allocation3], 0  ;;  %s651_s0 = inlined_call_operand.hbm [shape: f32[16,128], index: 0, kind: input, shape index: {}]   ;;  %s652_s1 = inlined_call_operand.hbm [shape: f32[256,128], index: 1, kind: input, shape index: {}]   ;;  %s653_s2 = inlined_call_operand.hbm [shape: f32[256,128], index: 2, kind: input, shape index: {}]   ;;  %s654_s3 = inlined_call_operand.hbm [shape: f32[16,128], index: 3, kind: output, shape index: {}]  }
   0x1   :  { %9 = vsyncpa [#allocation6], 0 }
   0x2   :  { %10 = vsyncpa [#allocation4], 0  ;;  %s554_s12 = smov [#allocation5]   ;;  %s555_s14 = smov [#allocation2]  }
   0x3   :  { %s28_s13 = sshll.u32 %s554_s12, 4  ;;  %s16_s15 = sshll.u32 %s555_s14, 4  ;;  %s29_s13 = int_to_ptr.vmem [resolvable:$true] %s28_s13  ;;  %s580_s15 = int_to_ptr.vmem [resolvable:$true] %s16_s15 }
   0x4   :  { %s460_s18 = scalar_lea.hbm %s652_s1, 4096 }
   0x5   :  { %p461_p0 = scmp.ne.s32.totalorder %s652_s1, %s460_s18  ;;  %p464_p1 = scmp.lt.u32.totalorder %s460_s18, %s652_s1 }
   0x7   :  { %p466_p2 = pnand %p464_p1, %p461_p0 }
   0x9   :  { %469 = shalt.err (!%p466_p2)
}
   0xa   :  { %s470_s23 = scalar_lea.vmem %s29_s13, 4096  ;;  %p475_p4 = scmp.lt.s32.totalorder %s29_s13, %s29_s13 }
   0xb   :  { %p471_p3 = scmp.ne.s32.totalorder %s29_s13, %s470_s23  ;;  %p476_p5 = scmp.lt.s32.totalorder %s470_s23, %s470_s23 }
   0xd   :  { %p477_p6 = por %p476_p5, %p475_p4 }
   0xf   :  { %p478_p7 = pnand %p477_p6, %p471_p3 }
  0x11   :  { %481 = shalt.err (!%p478_p7)
}
  0x12   :  { %s556_s24 = smov 128   ;;  %s557_s25 = smov 8  }
  0x13   :  { %34 = dma.hbm_to_vmem [thread:$0]  %s652_s1, 4096, %s29_s13, [#allocation6], %s556_s24, %s556_s24, %s557_s25  }
  0x14   :  { %s482_s30 = scalar_lea.hbm %s651_s0, 256 }
  0x15   :  { %p483_p8 = scmp.ne.s32.totalorder %s651_s0, %s482_s30  ;;  %p486_p9 = scmp.lt.u32.totalorder %s482_s30, %s651_s0 }
  0x17   :  { %p488_p10 = pnand %p486_p9, %p483_p8 }
  0x19   :  { %491 = shalt.err (!%p488_p10)
}
  0x1a   :  { %s492_s8 = scalar_lea.vmem %s580_s15, 256  ;;  %p497_p12 = scmp.lt.s32.totalorder %s580_s15, %s580_s15 }
  0x1b   :  { %p493_p11 = scmp.ne.s32.totalorder %s580_s15, %s492_s8  ;;  %p498_p13 = scmp.lt.s32.totalorder %s492_s8, %s492_s8 }
  0x1d   :  { %p499_p0 = por %p498_p13, %p497_p12 }
  0x1f   :  { %p500_p1 = pnand %p499_p0, %p493_p11 }
  0x21   :  { %503 = shalt.err (!%p500_p1)
}
  0x22   :  { %22 = dma.hbm_to_vmem [thread:$0]  %s651_s0, 256, %s580_s15, [#allocation3], %s556_s24, %s556_s24, %s557_s25  }
  0x23   :  { %s558_s10 = smov [#allocation7]   ;;  %s504_s14 = scalar_lea.hbm %s653_s2, 4096 }
  0x24   :  { %s40_s11 = sshll.u32 %s558_s10, 4  ;;  %p505_p2 = scmp.ne.s32.totalorder %s653_s2, %s504_s14  ;;  %s41_s11 = int_to_ptr.vmem [resolvable:$true] %s40_s11 }
  0x25   :  { %p508_p3 = scmp.lt.u32.totalorder %s504_s14, %s653_s2 }
  0x27   :  { %p510_p4 = pnand %p508_p3, %p505_p2 }
  0x29   :  { %513 = shalt.err (!%p510_p4)
}
  0x2a   :  { %s514_s20 = scalar_lea.vmem %s41_s11, 4096  ;;  %p519_p6 = scmp.lt.s32.totalorder %s41_s11, %s41_s11 }
  0x2b   :  { %p515_p5 = scmp.ne.s32.totalorder %s41_s11, %s514_s20  ;;  %p520_p7 = scmp.lt.s32.totalorder %s514_s20, %s514_s20 }
  0x2d   :  { %p521_p8 = por %p520_p7, %p519_p6 }
  0x2f   :  { %p522_p9 = pnand %p521_p8, %p515_p5 }
  0x31   :  { %525 = shalt.err (!%p522_p9)
}
  0x32   :  { %46 = dma.hbm_to_vmem [thread:$0]  %s653_s2, 4096, %s41_s11, [#allocation6], %s556_s24, %s556_s24, %s557_s25  }
  0x33   :  { %548 = dma.done.wait [#allocation3], 256  }
  0x34   :  { %549 = vsyncadd [#allocation3], 4294967040 }
  0x35   :  { %550 = dma.done.wait [#allocation6], 8192  }
  0x36   :  { %551 = vsyncadd [#allocation6], 4294959104  ;;  %v74_v0 = vld [vmem:[#allocation5 + $0x80] sm:$0xff]  ;;  %v75_v1 = vld [vmem:[#allocation5 + $0x88] sm:$0xff]  ;;  %s559_s2 = smov [#allocation8]  }
  0x37   :  { %v58_v2 = vld [vmem:[#allocation5] sm:$0xff]  ;;  %v390_v3 = vpack.c.bf16 %v75_v1, %v74_v0  ;;  %v59_v4 = vld [vmem:[#allocation5 + $0x8] sm:$0xff]  ;;  %v76_v5 = vld [vmem:[#allocation5 + $0x90] sm:$0xff]  ;;  %s303_s21 = sshll.u32 %s559_s2, 4  ;;  %s304_s21 = int_to_ptr.vmem [resolvable:$true] %s303_s21 }
  0x38   :  { %v77_v6 = vld [vmem:[#allocation5 + $0x98] sm:$0xff]  ;;  %v392_v7 = vpack.c.bf16 %v59_v4, %v58_v2  ;;  %v60_v9 = vld [vmem:[#allocation5 + $0x10] sm:$0xff]  ;;  %v78_v11 = vld [vmem:[#allocation5 + $0xa0] sm:$0xff]  ;;  %s526_s22 = scalar_lea.vmem %s304_s21, 256  ;;  %p531_p11 = scmp.lt.s32.totalorder %s304_s21, %s304_s21 }
  0x39   :  { %v394_v8 = vpack.c.bf16 %v77_v6, %v76_v5  ;;  %391 = vmatprep.subr.bf16.mxu0 %v390_v3  ;;  %v61_v10 = vld [vmem:[#allocation5 + $0x18] sm:$0xff]  ;;  %v79_v12 = vld [vmem:[#allocation5 + $0xa8] sm:$0xff]  ;;  %v632_v15 = vld [vmem:[#allocation2] sm:$0xff]  ;;  %p527_p10 = scmp.ne.s32.totalorder %s304_s21, %s526_s22  ;;  %p532_p12 = scmp.lt.s32.totalorder %s526_s22, %s526_s22 }
  0x3a   :  { %393 = vmatpush3.bf16.xpose.msra.mxu0 %v392_v7  ;;  %v396_v13 = vpack.c.bf16 %v61_v10, %v60_v9  ;;  %v398_v14 = vpack.c.bf16 %v79_v12, %v78_v11  ;;  %v62_v16 = vld [vmem:[#allocation5 + $0x20] sm:$0xff]  ;;  %v63_v17 = vld [vmem:[#allocation5 + $0x28] sm:$0xff]  ;;  %348 = vmatprep.mubr.f32.mxu0 %v632_v15  ;;  %v80_v20 = vld [vmem:[#allocation5 + $0xb0] sm:$0xff] }
  0x3b   :  { %395 = vmatprep.subr.bf16.mxu0 %v394_v8  ;;  %v191_v18 = vld [vmem:[#allocation7 + $0x80] sm:$0xff]  ;;  %v192_v19 = vld [vmem:[#allocation7 + $0x88] sm:$0xff]  ;;  %v193_v24 = vld [vmem:[#allocation7 + $0x90] sm:$0xff]  ;;  %v400_v34 = vpack.c.bf16 %v63_v17, %v62_v16  ;;  %p533_p13 = por %p532_p12, %p531_p11 }
  0x3c   :  { %v422_v21 = vpack.c.bf16 %v192_v19, %v191_v18  ;;  %v175_v22 = vld [vmem:[#allocation7] sm:$0xff]  ;;  %v176_v23 = vld [vmem:[#allocation7 + $0x8] sm:$0xff]  ;;  %v194_v26 = vld [vmem:[#allocation7 + $0x98] sm:$0xff] }
  0x3d   :  { %v424_v25 = vpack.c.bf16 %v176_v23, %v175_v22  ;;  %v177_v27 = vld [vmem:[#allocation7 + $0x10] sm:$0xff]  ;;  %v178_v28 = vld [vmem:[#allocation7 + $0x18] sm:$0xff]  ;;  %v426_v30 = vpack.c.bf16 %v194_v26, %v193_v24  ;;  %v195_v31 = vld [vmem:[#allocation7 + $0xa0] sm:$0xff]  ;;  %p534_p0 = pnand %p533_p13, %p527_p10 }
  0x3e   :  { %v81_v29 = vld [vmem:[#allocation5 + $0xb8] sm:$0xff]  ;;  %423 = vmatprep.subr.bf16.mxu1 %v422_v21  ;;  %v196_v32 = vld [vmem:[#allocation7 + $0xa8] sm:$0xff]  ;;  %v428_v33 = vpack.c.bf16 %v178_v28, %v177_v27  ;;  %v179_v36 = vld [vmem:[#allocation7 + $0x20] sm:$0xff] }
  0x3f   :  { %425 = vmatpush3.bf16.msra.mxu1 %v424_v25  ;;  %v430_v35 = vpack.c.bf16 %v196_v32, %v195_v31  ;;  %v180_v37 = vld [vmem:[#allocation7 + $0x28] sm:$0xff]  ;;  %v402_v38 = vpack.c.bf16 %v81_v29, %v80_v20  ;;  %v197_v39 = vld [vmem:[#allocation7 + $0xb0] sm:$0xff]  ;;  %v198_v40 = vld [vmem:[#allocation7 + $0xb8] sm:$0xff] }
  0x40   :  { %427 = vmatprep.subr.bf16.mxu1 %v426_v30  ;;  %v432_v41 = vpack.c.bf16 %v180_v37, %v179_v36  ;;  %v64_v42 = vld [vmem:[#allocation5 + $0x30] sm:$0xff]  ;;  %v434_v43 = vpack.c.bf16 %v198_v40, %v197_v39  ;;  %v182_v45 = vld [vmem:[#allocation7 + $0x38] sm:$0xff]  ;;  %v199_v47 = vld [vmem:[#allocation7 + $0xc0] sm:$0xff] }
  0x41   :  { %v181_v44 = vld [vmem:[#allocation7 + $0x30] sm:$0xff]  ;;  %v65_v46 = vld [vmem:[#allocation5 + $0x38] sm:$0xff]  ;;  %v200_v48 = vld [vmem:[#allocation7 + $0xc8] sm:$0xff] }
  0x42   :  { %397 = vmatpush3.bf16.xpose.msra.mxu0 %v396_v13  ;;  %v82_v49 = vld [vmem:[#allocation5 + $0xc0] sm:$0xff]  ;;  %v83_v50 = vld [vmem:[#allocation5 + $0xc8] sm:$0xff]  ;;  %v436_v51 = vpack.c.bf16 %v182_v45, %v181_v44  ;;  %v404_v52 = vpack.c.bf16 %v65_v46, %v64_v42  ;;  %v438_v53 = vpack.c.bf16 %v200_v48, %v199_v47  ;;  %v201_v57 = vld [vmem:[#allocation7 + $0xd0] sm:$0xff] }
  0x43   :  { %399 = vmatprep.subr.bf16.mxu0 %v398_v14  ;;  %429 = vmatpush3.bf16.msra.mxu1 %v428_v33  ;;  %v183_v54 = vld [vmem:[#allocation7 + $0x40] sm:$0xff]  ;;  %v184_v55 = vld [vmem:[#allocation7 + $0x48] sm:$0xff]  ;;  %v406_v56 = vpack.c.bf16 %v83_v50, %v82_v49  ;;  %v202_v58 = vld [vmem:[#allocation7 + $0xd8] sm:$0xff] }
  0x44   :  { %431 = vmatprep.subr.bf16.mxu1 %v430_v35  ;;  %v440_v59 = vpack.c.bf16 %v184_v55, %v183_v54  ;;  %v66_v60 = vld [vmem:[#allocation5 + $0x40] sm:$0xff]  ;;  %v442_v61 = vpack.c.bf16 %v202_v58, %v201_v57  ;;  %v185_v62 = vld [vmem:[#allocation7 + $0x50] sm:$0xff]  ;;  %v186_v63 = vld [vmem:[#allocation7 + $0x58] sm:$0xff] }
  0x45   :  { %v67_v0 = vld [vmem:[#allocation5 + $0x48] sm:$0xff]  ;;  %v203_v1 = vld [vmem:[#allocation7 + $0xe0] sm:$0xff]  ;;  %v84_v3 = vld [vmem:[#allocation5 + $0xd0] sm:$0xff]  ;;  %v444_v5 = vpack.c.bf16 %v186_v63, %v185_v62 }
  0x46   :  { %v204_v2 = vld [vmem:[#allocation7 + $0xe8] sm:$0xff]  ;;  %v85_v4 = vld [vmem:[#allocation5 + $0xd8] sm:$0xff]  ;;  %v408_v6 = vpack.c.bf16 %v67_v0, %v66_v60  ;;  %v68_v9 = vld [vmem:[#allocation5 + $0x50] sm:$0xff] }
  0x47   :  { %433 = vmatpush3.bf16.msra.mxu1 %v432_v41  ;;  %v446_v7 = vpack.c.bf16 %v204_v2, %v203_v1  ;;  %v410_v8 = vpack.c.bf16 %v85_v4, %v84_v3  ;;  %v69_v10 = vld [vmem:[#allocation5 + $0x58] sm:$0xff]  ;;  %v86_v11 = vld [vmem:[#allocation5 + $0xe0] sm:$0xff]  ;;  %v87_v12 = vld [vmem:[#allocation5 + $0xe8] sm:$0xff] }
  0x48   :  { %435 = vmatprep.subr.bf16.mxu1 %v434_v43  ;;  %v412_v13 = vpack.c.bf16 %v69_v10, %v68_v9  ;;  %v414_v14 = vpack.c.bf16 %v87_v12, %v86_v11  ;;  %v70_v16 = vld [vmem:[#allocation5 + $0x60] sm:$0xff]  ;;  %v71_v17 = vld [vmem:[#allocation5 + $0x68] sm:$0xff]  ;;  %v88_v18 = vld [vmem:[#allocation5 + $0xf0] sm:$0xff] }
  0x49   :  { %v89_v19 = vld [vmem:[#allocation5 + $0xf8] sm:$0xff]  ;;  %v416_v20 = vpack.c.bf16 %v71_v17, %v70_v16  ;;  %v72_v22 = vld [vmem:[#allocation5 + $0x70] sm:$0xff]  ;;  %v187_v26 = vld [vmem:[#allocation7 + $0x60] sm:$0xff] }
  0x4a   :  { %401 = vmatpush3.bf16.xpose.msra.mxu0 %v400_v34  ;;  %v418_v21 = vpack.c.bf16 %v89_v19, %v88_v18  ;;  %v73_v23 = vld [vmem:[#allocation5 + $0x78] sm:$0xff]  ;;  %v188_v27 = vld [vmem:[#allocation7 + $0x68] sm:$0xff]  ;;  %v205_v29 = vld [vmem:[#allocation7 + $0xf0] sm:$0xff] }
  0x4b   :  { %403 = vmatprep.subr.bf16.mxu0 %v402_v38  ;;  %437 = vmatpush3.bf16.msra.mxu1 %v436_v51  ;;  %v420_v24 = vpack.c.bf16 %v73_v23, %v72_v22  ;;  %v57_v25 = vld [vmem:[#allocation2 + $0x8] sm:$0xff]  ;;  %v448_v28 = vpack.c.bf16 %v188_v27, %v187_v26  ;;  %v189_v32 = vld [vmem:[#allocation7 + $0x70] sm:$0xff] }
  0x4c   :  { %439 = vmatprep.subr.bf16.mxu1 %v438_v53  ;;  %v206_v30 = vld [vmem:[#allocation7 + $0xf8] sm:$0xff] }
  0x4d   :  { %v450_v31 = vpack.c.bf16 %v206_v30, %v205_v29  ;;  %v190_v33 = vld [vmem:[#allocation7 + $0x78] sm:$0xff] }
  0x4e   :  { %v452_v34 = vpack.c.bf16 %v190_v33, %v189_v32 }
  0x4f   :  { %441 = vmatpush3.bf16.msra.mxu1 %v440_v59 }
  0x50   :  { %443 = vmatprep.subr.bf16.mxu1 %v442_v61 }
  0x52   :  { %405 = vmatpush3.bf16.xpose.msra.mxu0 %v404_v52 }
  0x53   :  { %407 = vmatprep.subr.bf16.mxu0 %v406_v56  ;;  %445 = vmatpush3.bf16.msra.mxu1 %v444_v5 }
  0x54   :  { %447 = vmatprep.subr.bf16.mxu1 %v446_v7 }
  0x57   :  { %449 = vmatpush3.bf16.msra.mxu1 %v448_v28 }
  0x58   :  { %451 = vmatprep.subr.bf16.mxu1 %v450_v31 }
  0x5a   :  { %409 = vmatpush3.bf16.xpose.msra.mxu0 %v408_v6 }
  0x5b   :  { %411 = vmatprep.subr.bf16.mxu0 %v410_v8  ;;  %453 = vmatpush3.bf16.msra.mxu1 %v452_v34 }
  0x62   :  { %413 = vmatpush3.bf16.xpose.msra.mxu0 %v412_v13 }
  0x63   :  { %415 = vmatprep.subr.bf16.mxu0 %v414_v14 }
  0x6a   :  { %417 = vmatpush3.bf16.xpose.msra.mxu0 %v416_v20 }
  0x6b   :  { %419 = vmatprep.subr.bf16.mxu0 %v418_v21 }
  0x72   :  { %421 = vmatpush3.bf16.xpose.msra.mxu0 %v420_v24 }
  0x79   :  { %349 = vmatmul.mubr.f32.vlgmr.msra.gmra.mrb[0].mxu0 %v632_v15 }
  0x7a   :  { %350 = vmatprep.mubr.f32.mxu0 %v57_v25 }
  0x7d   :  { %351 = vmatmul.mubr.f32.gmra.mrb[2].mxu0 %v57_v25 }
 0x14c   :  { %v156_v35 = vpop.f32.mrb[0].mxu0 }
 0x14d   :  { %v167_v36 = vmax.f32 %v156_v35, 0.0  ;;  %v158_v37 = vpop.f32.mrb[1].mxu0 }
 0x14e   :  { %v168_v38 = vmax.f32 %v158_v37, 0.0 }
 0x14f   :  { %v171_v40 = vmul.f32 %v167_v36, %v167_v36 }
 0x150   :  { %v162_v39 = vpop.f32.mrb[2].mxu0  ;;  %v172_v15 = vmul.f32 %v168_v38, %v168_v38 }
 0x151   :  { %v169_v41 = vmax.f32 %v162_v39, 0.0  ;;  %v164_v42 = vpop.f32.mrb[3].mxu0 }
 0x152   :  { %v170_v43 = vmax.f32 %v164_v42, 0.0  ;;  %271 = vmatprep.mubr.f32.mxu1 %v172_v15 }
 0x153   :  { %272 = vmatmul.mubr.f32.vlgmr.msra.gmra.mrb[0].mxu1 %v171_v40  ;;  %v173_v45 = vmul.f32 %v169_v41, %v169_v41 }
 0x154   :  { %v174_v44 = vmul.f32 %v170_v43, %v170_v43 }
 0x156   :  { %276 = vmatprep.mubr.f32.mxu1 %v174_v44 }
 0x157   :  { %277 = vmatmul.mubr.f32.gmra.mrb[2].mxu1 %v173_v45 }
 0x226   :  { %v384_v46 = vpop.f32.mrb[0].mxu1 }
 0x227   :  { %v385_v47 = vpop.f32.mrb[1].mxu1 }
 0x228   :  { %v386_v48 = vadd.f32 %v385_v47, %v384_v46 }
 0x22a   :  { %286 = vst [vmem:[#allocation8] sm:$0xff] %v386_v48  ;;  %v387_v49 = vpop.f32.mrb[2].mxu1 }
 0x22b   :  { %v388_v50 = vpop.f32.mrb[3].mxu1 }
 0x22c   :  { %v389_v51 = vadd.f32 %v388_v50, %v387_v49 }
 0x22e   :  { %287 = vst [vmem:[#allocation8 + $0x8] sm:$0xff] %v389_v51 }
 0x22f   :  { %537 = shalt.err (!%p534_p0)
}
 0x230   :  { %s538_s27 = scalar_lea.hbm %s654_s3, 256 }
 0x231   :  { %p539_p1 = scmp.ne.s32.totalorder %s654_s3, %s538_s27  ;;  %p542_p2 = scmp.lt.u32.totalorder %s538_s27, %s654_s3 }
 0x233   :  { %p544_p3 = pnand %p542_p2, %p539_p1 }
 0x235   :  { %547 = shalt.err (!%p544_p3)
}
 0x236   :  { %309 = dma.vmem_to_hbm [thread:$0]  %s304_s21, 256, %s654_s3, [#allocation4], %s556_s24, %s556_s24, %s557_s25  }
 0x237   :  { %552 = dma.done.wait [#allocation4], 256  }
 0x238   :  { %553 = vsyncadd [#allocation4], 4294967040 }
 0x239   :  { %313 = vsyncpa [#allocation3], 1 }
 0x23a   :  { %314 = vsyncpa [#allocation6], 1 }
 0x23b   :  { %315 = vsyncpa [#allocation4], 1 }

</bundles_post_ra>
